<compile_context>
chip_gen: v7x
topology: tpu7x:2x2x1
jax: 0.10.0
libtpu: 0.0.40
codegen_flags: <defaults>
</compile_context>

<pallas_src>
import functools
import math

import jax
import jax.numpy as jnp
from jax import lax
from jax.experimental import pallas as pl
from jax.experimental.pallas import tpu as pltpu


_LANE_COLS = 512                      # lane-dense width (multiple of 128)
_SUPPORTED = ("relu", "leakyrelu", "gelu", "swish", "tanh", "sigmoid")

_SQRT_2_OVER_PI = math.sqrt(2.0 / math.pi)
_INV_SQRT_2 = 1.0 / math.sqrt(2.0)


# --------------------------------------------------------------------------
# Kernel
# --------------------------------------------------------------------------
def _activation_kernel(x_ref, o_ref, *, act_type: str, negative_slope: float,
                       gelu_approximate: bool):
    x = x_ref[...]

    if act_type == "relu":
        # Native dtype (bf16 stays packed on v6e/v7x VALU).
        y = jnp.maximum(x, 0)
    elif act_type == "leakyrelu":
        y = jnp.where(x >= 0, x, x * negative_slope)
    else:
        # Transcendental activations: compute in f32 for accuracy.
        xf = x.astype(jnp.float32)
        if act_type == "gelu":
            if gelu_approximate:
                # tanh-approx GELU: heavy work on the (otherwise idle) EUP slot
                # -> stays HBM-bound on v6e bf16 and on v7x.
                inner = _SQRT_2_OVER_PI * (xf + 0.044715 * (xf * xf * xf))
                y = 0.5 * xf * (1.0 + jnp.tanh(inner))
            else:
                # Exact erf variant (PyTorch nn.GELU() default numerics).
                y = 0.5 * xf * (1.0 + lax.erf(xf * _INV_SQRT_2))
        elif act_type == "swish":
            # SiLU: x * sigmoid(x), sigmoid as one EUP tanh (no VALU divide).
            y = xf * (0.5 * jnp.tanh(0.5 * xf) + 0.5)
        elif act_type == "tanh":
            y = jnp.tanh(xf)
        elif act_type == "sigmoid":
            y = 0.5 * jnp.tanh(0.5 * xf) + 0.5
        else:
            raise NotImplementedError(act_type)

    o_ref[...] = y.astype(o_ref.dtype)


# --------------------------------------------------------------------------
# Per-generation block-size selection
# --------------------------------------------------------------------------
@functools.lru_cache(maxsize=1)
def _target_block_bytes() -> int:
    """Logical block size; pipelined footprint ~= 4x (in+out double-buffered)."""
    try:
        kind = jax.devices()[0].device_kind.lower()
    except Exception:  # pragma: no cover - be conservative if query fails
        return 2 << 20
    # v6e / v7x: 32 MiB default scoped VMEM -> 4 MiB block (16 MiB footprint).
    if ("v6" in kind) or ("v7" in kind):
        return 4 << 20
    # v5e and older: 16 MiB default scoped VMEM -> keep 2 MiB (8 MiB footprint).
    return 2 << 20


# --------------------------------------------------------------------------
# Wrapper ("Activation" module forward on the values tensor)
# --------------------------------------------------------------------------
def activation_forward(values, act_type: str = "ReLU", negative_slope: float = 0.1,
                       gelu_approximate=None, donate: bool = False):
    """Elementwise activation matching PyTorch Activation.forward semantics
    (shape and dtype preserved).  `donate=True` allows the output to alias the
    input buffer (in-place semantics of the original module)."""
    act = act_type.lower()
    if act not in _SUPPORTED:
        raise NotImplementedError(act_type)

    orig_shape = values.shape
    orig_dtype = values.dtype
    n = values.size
    if n == 0:
        return values

    if gelu_approximate is None:
        # bf16/f16 mantissa hides the tanh-approx error; f32 keeps PyTorch's
        # exact erf numerics unless the caller opts in (worth it on v7x).
        gelu_approximate = jnp.dtype(orig_dtype).itemsize < 4

    # ---- lane-dense slab --------------------------------------------------
    cols = _LANE_COLS
    flat = values.reshape(-1)                      # free (row-major view)
    padded = (n % cols) != 0
    if padded:
        # Pad only up to a multiple of cols; allow_input_fusion below lets XLA
        # fuse this pad into the pallas input instead of a full HBM round trip.
        padded_n = pl.cdiv(n, cols) * cols
        flat = jnp.pad(flat, (0, padded_n - n))
    else:
        padded_n = n
    rows = padded_n // cols
    slab = flat.reshape(rows, cols)

    # ---- row tile: generation-sized block, but keep >=2 grid steps ---------
    itemsize = jnp.dtype(orig_dtype).itemsize
    block_bytes = _target_block_bytes()
    tile_rows = max(8, (block_bytes // (cols * itemsize)) // 8 * 8)
    if rows > 8:
        # More than one minimal (8-row) tile: guarantee >=2 grid steps so the
        # "parallel" axis can be sharded across both v7x TensorCores.
        tile_rows = min(tile_rows, max(8, (rows // 2) // 8 * 8))
    tile_rows = min(tile_rows, rows)
    grid = (pl.cdiv(rows, tile_rows),)

    kernel = functools.partial(
        _activation_kernel,
        act_type=act,
        negative_slope=float(negative_slope),
        gelu_approximate=bool(gelu_approximate),
    )

    out_slab = pl.pallas_call(
        kernel,
        out_shape=jax.ShapeDtypeStruct((rows, cols), orig_dtype),
        grid_spec=pltpu.PrefetchScalarGridSpec(
            num_scalar_prefetch=0,
            grid=grid,
            in_specs=[pl.BlockSpec((tile_rows, cols), lambda i: (i, 0))],
            out_specs=pl.BlockSpec((tile_rows, cols), lambda i: (i, 0)),
        ),
        compiler_params=pltpu.CompilerParams(
            dimension_semantics=("parallel",),
            allow_input_fusion=[True] if padded else None,
        ),
        input_output_aliases={0: 0} if donate else {},
    )(slab)

    out_flat = out_slab.reshape(-1)
    if padded:
        out_flat = out_flat[:n]
    return out_flat.reshape(orig_shape)


# --------------------------------------------------------------------------
# Reference (plain JAX) for verification
# --------------------------------------------------------------------------
def _reference(values, act_type, negative_slope=0.1, gelu_approximate=False):
    act = act_type.lower()
    x = values.astype(jnp.float32)
    if act == "relu":
        y = jax.nn.relu(x)
    elif act == "leakyrelu":
        y = jnp.where(x >= 0, x, x * negative_slope)
    elif act == "gelu":
        y = jax.nn.gelu(x, approximate=bool(gelu_approximate))
    elif act == "swish":
        y = jax.nn.silu(x)
    elif act == "tanh":
        y = jnp.tanh(x)
    elif act == "sigmoid":
        y = jax.nn.sigmoid(x)
    else:
        raise NotImplementedError(act_type)
    return y.astype(values.dtype)


if __name__ == "__main__":
    key = jax.random.PRNGKey(0)
    # DiscretizedField.values: (batch=2, num_points=64, channels=32)
    x = jax.random.normal(key, (2, 64, 32), dtype=jnp.float32)

    # f32 defaults (exact erf GELU, exact tanh-form sigmoid/swish).
    for act_type in ["ReLU", "LeakyReLU", "GELU", "Swish", "Tanh", "Sigmoid"]:
        out = jax.block_until_ready(
            activation_forward(x, act_type=act_type, negative_slope=0.1)
        )
        ref = _reference(x, act_type, negative_slope=0.1, gelu_approximate=False)
        assert out.shape == x.shape and out.dtype == x.dtype
        assert jnp.allclose(out, ref, atol=2e-5, rtol=2e-5), act_type

    # Opt-in tanh-approx GELU (recommended on v6e bf16 / all of v7x).
    out_ap = jax.block_until_ready(
        activation_forward(x, act_type="GELU", gelu_approximate=True)
    )
    ref_ap = _reference(x, "GELU", gelu_approximate=True)
    assert jnp.allclose(out_ap, ref_ap, atol=2e-5, rtol=2e-5)

    # Non-aligned element count -> minimal pad path (multiple of 512 only).
    x_odd = jax.random.normal(jax.random.PRNGKey(1), (3, 50, 7), dtype=jnp.float32)
    out_odd = jax.block_until_ready(activation_forward(x_odd, act_type="GELU"))
    ref_odd = _reference(x_odd, "GELU", gelu_approximate=False)
    assert out_odd.shape == x_odd.shape
    assert jnp.allclose(out_odd, ref_odd, atol=2e-5, rtol=2e-5)

    # bf16: native-dtype ReLU (exact) and auto tanh-approx GELU.
    x_bf16 = jax.random.normal(jax.random.PRNGKey(2), (2, 64, 32)).astype(jnp.bfloat16)
    out_bf16 = jax.block_until_ready(activation_forward(x_bf16, act_type="ReLU"))
    assert out_bf16.dtype == jnp.bfloat16
    assert jnp.array_equal(out_bf16, _reference(x_bf16, "ReLU"))
    out_bf16_g = jax.block_until_ready(activation_forward(x_bf16, act_type="GELU"))
    ref_bf16_g = _reference(x_bf16, "GELU", gelu_approximate=True)
    assert jnp.allclose(out_bf16_g.astype(jnp.float32),
                        ref_bf16_g.astype(jnp.float32), atol=2e-2, rtol=2e-2)

    # Aliased (in-place style) call; do not reuse x_copy afterwards.
    x_copy = x + 0.0
    out_d = jax.block_until_ready(
        activation_forward(x_copy, act_type="Swish", donate=True)
    )
    assert jnp.allclose(out_d, _reference(x, "Swish"), atol=2e-5, rtol=2e-5)

    print("KERNEL_OK")
</pallas_src>

<mosaic_0001>
module attributes {stable_mosaic.version = 11 : i64} {
  func.func @_activation_kernel(%arg0: i32, %arg1: memref<8x512xf32, #tpu.memory_space<vmem>>, %arg2: memref<8x512xf32, #tpu.memory_space<vmem>>) attributes {dimension_semantics = [#tpu.dimension_semantics<parallel>], iteration_bounds = array<i64: 1>, scalar_prefetch = 0 : i64, scratch_operands = 0 : i64, tpu.core_type = #tpu.core_type<tc>, window_params = [{transform_indices = @transform_0, window_bounds = array<i64: 8, 512>}, {transform_indices = @transform_1, window_bounds = array<i64: 8, 512>}]} {
    %c0 = arith.constant 0 : index
    %c0_0 = arith.constant 0 : index
    %0 = vector.load %arg1[%c0, %c0_0] : memref<8x512xf32, #tpu.memory_space<vmem>>, vector<8x512xf32>
    %cst = arith.constant 0.000000e+00 : f32
    %1 = vector.broadcast %cst : f32 to vector<8x512xf32>
    %2 = arith.maximumf %0, %1 : vector<8x512xf32>
    %c0_1 = arith.constant 0 : index
    %c0_2 = arith.constant 0 : index
    %3 = vector.load %arg2[%c0_1, %c0_2] : memref<8x512xf32, #tpu.memory_space<vmem>>, vector<8x512xf32>
    tpu.vector_store %arg2[%c0_1, %c0_2], %2 {strides = array<i32>} : memref<8x512xf32, #tpu.memory_space<vmem>>, vector<8x512xf32>,
    return
  }
  func.func @transform_0(%arg0: i32) -> (i32, i32) {
    %c0_i32 = arith.constant 0 : i32
    %c0_i32_0 = arith.constant 0 : i32
    return %arg0, %c0_i32 : i32, i32
  }
  func.func @transform_1(%arg0: i32) -> (i32, i32) {
    %c0_i32 = arith.constant 0 : i32
    %c0_i32_0 = arith.constant 0 : i32
    return %arg0, %c0_i32 : i32, i32
  }
}

</mosaic_0001>

<bundles_post_ra>
// kernel: tpu_custom_call.1
= control target key start
LH: loop header
LB: loop body
LE: loop exit
PB: predicated region body
PF: predicated region fallthrough
CT: control target
= control target key end

     0   :  { %6 = vsyncpa [#allocation3], 0  ;;  %s134_s0 = inlined_call_operand.hbm [shape: f32[8,512], index: 0, kind: input, shape index: {}]   ;;  %s135_s1 = inlined_call_operand.hbm [shape: f32[8,512], index: 1, kind: output, shape index: {}]  }
   0x1   :  { %7 = vsyncpa [#allocation4], 0  ;;  %s98_s6 = smov [#allocation2]   ;;  %s50_s10 = scalar_lea.hbm %s134_s0, 512 }
   0x2   :  { %s14_s7 = sshll.u32 %s98_s6, 4  ;;  %p51_p0 = scmp.ne.s32.totalorder %s134_s0, %s50_s10  ;;  %s15_s7 = int_to_ptr.vmem [resolvable:$true] %s14_s7 }
   0x3   :  { %p54_p1 = scmp.lt.u32.totalorder %s50_s10, %s134_s0 }
   0x5   :  { %p56_p2 = pnand %p54_p1, %p51_p0 }
   0x7   :  { %59 = shalt.err (!%p56_p2)
}
   0x8   :  { %s60_s15 = scalar_lea.vmem %s15_s7, 512  ;;  %p65_p4 = scmp.lt.s32.totalorder %s15_s7, %s15_s7 }
   0x9   :  { %p61_p3 = scmp.ne.s32.totalorder %s15_s7, %s60_s15  ;;  %p66_p5 = scmp.lt.s32.totalorder %s60_s15, %s60_s15 }
   0xb   :  { %p67_p6 = por %p66_p5, %p65_p4 }
   0xd   :  { %p68_p7 = pnand %p67_p6, %p61_p3 }
   0xf   :  { %71 = shalt.err (!%p68_p7)
}
  0x10   :  { %17 = dma.hbm_to_vmem [thread:$0]  %s134_s0, 512, %s15_s7, [#allocation3]  }
  0x11   :  { %94 = dma.done.wait [#allocation3], 512  }
  0x12   :  { %95 = vsyncadd [#allocation3], 4294966784  ;;  %s99_s18 = smov [#allocation5]   ;;  %v21_v0 = vld [vmem:[#allocation2] sm:$0xff]  ;;  %v22_v1 = vld [vmem:[#allocation2 + $0x8] sm:$0xff] }
  0x13   :  { %s39_s19 = sshll.u32 %s99_s18, 4  ;;  %v23_v2 = vld [vmem:[#allocation2 + $0x10] sm:$0xff]  ;;  %v25_v3 = vmax.f32 %v21_v0, 0.0  ;;  %v26_v4 = vmax.f32 %v22_v1, 0.0  ;;  %v24_v6 = vld [vmem:[#allocation2 + $0x18] sm:$0xff]  ;;  %s40_s19 = int_to_ptr.vmem [resolvable:$true] %s39_s19 }
  0x14   :  { %v27_v5 = vmax.f32 %v23_v2, 0.0  ;;  %v28_v7 = vmax.f32 %v24_v6, 0.0  ;;  %s72_s20 = scalar_lea.vmem %s40_s19, 512  ;;  %p77_p9 = scmp.lt.s32.totalorder %s40_s19, %s40_s19 }
  0x15   :  { %29 = vst [vmem:[#allocation5] sm:$0xff] %v25_v3  ;;  %30 = vst [vmem:[#allocation5 + $0x8] sm:$0xff] %v26_v4  ;;  %p73_p8 = scmp.ne.s32.totalorder %s40_s19, %s72_s20  ;;  %p78_p10 = scmp.lt.s32.totalorder %s72_s20, %s72_s20 }
  0x16   :  { %31 = vst [vmem:[#allocation5 + $0x10] sm:$0xff] %v27_v5  ;;  %32 = vst [vmem:[#allocation5 + $0x18] sm:$0xff] %v28_v7 }
  0x17   :  { %p79_p11 = por %p78_p10, %p77_p9 }
  0x19   :  { %p80_p12 = pnand %p79_p11, %p73_p8 }
  0x1b   :  { %83 = shalt.err (!%p80_p12)
}
  0x1c   :  { %s84_s22 = scalar_lea.hbm %s135_s1, 512 }
  0x1d   :  { %p85_p13 = scmp.ne.s32.totalorder %s135_s1, %s84_s22  ;;  %p88_p0 = scmp.lt.u32.totalorder %s84_s22, %s135_s1 }
  0x1f   :  { %p90_p1 = pnand %p88_p0, %p85_p13 }
  0x21   :  { %93 = shalt.err (!%p90_p1)
}
  0x22   :  { %42 = dma.vmem_to_hbm [thread:$0]  %s40_s19, 512, %s135_s1, [#allocation4]  }
  0x23   :  { %96 = dma.done.wait [#allocation4], 512  }
  0x24   :  { %97 = vsyncadd [#allocation4], 4294966784 }
  0x25   :  { %46 = vsyncpa [#allocation3], 1 }
  0x26   :  { %47 = vsyncpa [#allocation4], 1 }

</bundles_post_ra>
